<compile_context>
chip_gen: v6e
topology: v6e:2x2x1
jax: 0.10.0
libtpu: 0.0.40
codegen_flags: <defaults>
</compile_context>

<pallas_src>
import jax
import jax.numpy as jnp
from jax.experimental import pallas as pl
from jax.experimental.pallas import tpu as pltpu

HIDDEN = 256
LANE = 128


def _round_up(x, m):
    return (x + m - 1) // m * m


def fcnet2_kernel(x_ref, mask_ref, w1_ref, b1_ref, w2_ref, b2_ref,
                  w3_ref, b3_ref, o_ref):
    # fc1 (bf16 MXU operands, f32 accumulate) + bias + ReLU
    h = jnp.dot(x_ref[...], w1_ref[...], preferred_element_type=jnp.float32)
    h = jnp.maximum(h + b1_ref[...], 0.0)

    # fc2 + bias + ReLU
    h = jnp.dot(h.astype(jnp.bfloat16), w2_ref[...],
                preferred_element_type=jnp.float32)
    h = jnp.maximum(h + b2_ref[...], 0.0)

    # dropout(p=0.5), training mode: mask holds 0.0 (drop) or 2.0 (keep*1/(1-p))
    h = h * mask_ref[...]

    # fc3 + bias (output lane-padded to a multiple of 128)
    out = jnp.dot(h.astype(jnp.bfloat16), w3_ref[...],
                  preferred_element_type=jnp.float32)
    o_ref[...] = (out + b3_ref[...]).astype(o_ref.dtype)


def init_params(key, input_size, n):
    """Deterministic synthetic parameters with nn.Linear layouts ([out,in])."""
    ks = jax.random.split(key, 6)
    s = 0.05
    return {
        "w1": jax.random.normal(ks[0], (HIDDEN, input_size), jnp.float32) * s,
        "b1": jax.random.normal(ks[1], (HIDDEN,), jnp.float32) * s,
        "w2": jax.random.normal(ks[2], (HIDDEN, HIDDEN), jnp.float32) * s,
        "b2": jax.random.normal(ks[3], (HIDDEN,), jnp.float32) * s,
        "w3": jax.random.normal(ks[4], (n, HIDDEN), jnp.float32) * s,
        "b3": jax.random.normal(ks[5], (n,), jnp.float32) * s,
    }


def prepare_params(params, input_size, n):
    """Transpose to [in,out], zero-pad K and N to lane multiples, cast matmul
    operands to bf16 (biases stay f32).  Done once, outside the hot path."""
    k_pad = _round_up(input_size, LANE)
    n_pad = _round_up(n, LANE)
    w1t = jnp.zeros((k_pad, HIDDEN), jnp.bfloat16)
    w1t = w1t.at[:input_size, :].set(params["w1"].T.astype(jnp.bfloat16))
    w3t = jnp.zeros((HIDDEN, n_pad), jnp.bfloat16)
    w3t = w3t.at[:, :n].set(params["w3"].T.astype(jnp.bfloat16))
    b3 = jnp.zeros((1, n_pad), jnp.float32).at[0, :n].set(params["b3"])
    return {
        "w1t": w1t,
        "b1": params["b1"].reshape(1, HIDDEN).astype(jnp.float32),
        "w2t": params["w2"].T.astype(jnp.bfloat16),
        "b2": params["b2"].reshape(1, HIDDEN).astype(jnp.float32),
        "w3t": w3t,
        "b3": b3,
    }


def fcnet2_forward(x, prepped, dropout_key, *, input_size, n, tile_b=256):
    B = x.shape[0]
    k_pad = prepped["w1t"].shape[0]
    n_pad = prepped["w3t"].shape[1]

    tb = min(tile_b, _round_up(B, 16))       # batch tile (bf16-friendly sublanes)
    b_pad = _round_up(B, tb)

    # zero-pad batch & K, cast activations for the MXU
    xp = jnp.zeros((b_pad, k_pad), jnp.bfloat16)
    xp = xp.at[:B, :input_size].set(x.astype(jnp.bfloat16))

    # inverted-dropout scale mask: 0.0 w.p. 0.5, 2.0 w.p. 0.5
    keep = jax.random.bernoulli(dropout_key, 0.5, (b_pad, HIDDEN))
    mask = jnp.where(keep, jnp.float32(2.0), jnp.float32(0.0))

    grid = (b_pad // tb,)
    flops = 2 * b_pad * (k_pad * HIDDEN + HIDDEN * HIDDEN + HIDDEN * n_pad)
    bytes_accessed = int(
        xp.size * 2 + mask.size * 4 + b_pad * n_pad * 4
        + sum(int(v.size) * v.dtype.itemsize for v in prepped.values()))

    out = pl.pallas_call(
        fcnet2_kernel,
        out_shape=jax.ShapeDtypeStruct((b_pad, n_pad), jnp.float32),
        grid=grid,
        in_specs=[
            pl.BlockSpec((tb, k_pad), lambda i: (i, 0)),      # x tile
            pl.BlockSpec((tb, HIDDEN), lambda i: (i, 0)),     # dropout mask tile
            pl.BlockSpec((k_pad, HIDDEN), lambda i: (0, 0)),  # w1t (resident)
            pl.BlockSpec((1, HIDDEN), lambda i: (0, 0)),      # b1
            pl.BlockSpec((HIDDEN, HIDDEN), lambda i: (0, 0)), # w2t
            pl.BlockSpec((1, HIDDEN), lambda i: (0, 0)),      # b2
            pl.BlockSpec((HIDDEN, n_pad), lambda i: (0, 0)),  # w3t
            pl.BlockSpec((1, n_pad), lambda i: (0, 0)),       # b3
        ],
        out_specs=pl.BlockSpec((tb, n_pad), lambda i: (i, 0)),
        compiler_params=pltpu.CompilerParams(
            dimension_semantics=("parallel",)),
        cost_estimate=pl.CostEstimate(
            flops=flops, transcendentals=0, bytes_accessed=bytes_accessed),
    )(xp, mask, prepped["w1t"], prepped["b1"], prepped["w2t"], prepped["b2"],
      prepped["w3t"], prepped["b3"])

    return out[:B, :n]


if __name__ == "__main__":
    input_size = 32
    n = 16
    batch = 8

    key = jax.random.PRNGKey(0)
    k_x, k_p, k_d = jax.random.split(key, 3)
    x = jax.random.normal(k_x, (batch, input_size), jnp.float32)
    params = init_params(k_p, input_size, n)
    prepped = prepare_params(params, input_size, n)

    out = fcnet2_forward(x, prepped, k_d, input_size=input_size, n=n)
    out = jax.block_until_ready(out)

    assert out.shape == (batch, n)
    assert bool(jnp.all(jnp.isfinite(out)))
    print("KERNEL_OK")
</pallas_src>

<mosaic_0001>
module attributes {stable_mosaic.version = 11 : i64} {
  func.func @fcnet2_kernel(%arg0: i32, %arg1: memref<16x128xbf16, #tpu.memory_space<vmem>>, %arg2: memref<16x256xf32, #tpu.memory_space<vmem>>, %arg3: memref<128x256xbf16, #tpu.memory_space<vmem>>, %arg4: memref<1x256xf32, #tpu.memory_space<vmem>>, %arg5: memref<256x256xbf16, #tpu.memory_space<vmem>>, %arg6: memref<1x256xf32, #tpu.memory_space<vmem>>, %arg7: memref<256x128xbf16, #tpu.memory_space<vmem>>, %arg8: memref<1x128xf32, #tpu.memory_space<vmem>>, %arg9: memref<16x128xf32, #tpu.memory_space<vmem>>) attributes {dimension_semantics = [#tpu.dimension_semantics<parallel>], iteration_bounds = array<i64: 1>, scalar_prefetch = 0 : i64, scratch_operands = 0 : i64, tpu.core_type = #tpu.core_type<tc>, window_params = [{transform_indices = @transform_0, window_bounds = array<i64: 16, 128>}, {transform_indices = @transform_1, window_bounds = array<i64: 16, 256>}, {pipeline_mode = #tpu.pipeline_mode<synchronous>, transform_indices = @transform_2, window_bounds = array<i64: 128, 256>}, {pipeline_mode = #tpu.pipeline_mode<synchronous>, transform_indices = @transform_3, window_bounds = array<i64: 1, 256>}, {pipeline_mode = #tpu.pipeline_mode<synchronous>, transform_indices = @transform_4, window_bounds = array<i64: 256, 256>}, {pipeline_mode = #tpu.pipeline_mode<synchronous>, transform_indices = @transform_5, window_bounds = array<i64: 1, 256>}, {pipeline_mode = #tpu.pipeline_mode<synchronous>, transform_indices = @transform_6, window_bounds = array<i64: 256, 128>}, {pipeline_mode = #tpu.pipeline_mode<synchronous>, transform_indices = @transform_7, window_bounds = array<i64: 1, 128>}, {transform_indices = @transform_8, window_bounds = array<i64: 16, 128>}]} {
    %c0 = arith.constant 0 : index
    %c0_0 = arith.constant 0 : index
    %0 = vector.load %arg1[%c0, %c0_0] : memref<16x128xbf16, #tpu.memory_space<vmem>>, vector<16x128xbf16>
    %c0_1 = arith.constant 0 : index
    %c0_2 = arith.constant 0 : index
    %1 = vector.load %arg3[%c0_1, %c0_2] : memref<128x256xbf16, #tpu.memory_space<vmem>>, vector<128x256xbf16>
    %cst = arith.constant dense<0.000000e+00> : vector<16x256xf32>
    %2 = tpu.matmul %0, %1, %cst {dimension_numbers = #tpu.dot_dimension_numbers<[1], [0], [0], [1], [0, 0, 1, 1], [], []>} : vector<16x128xbf16>, vector<128x256xbf16>, vector<16x256xf32> -> vector<16x256xf32>
    %c0_3 = arith.constant 0 : index
    %c0_4 = arith.constant 0 : index
    %3 = vector.load %arg4[%c0_3, %c0_4] : memref<1x256xf32, #tpu.memory_space<vmem>>, vector<1x256xf32>
    %4 = vector.broadcast %3 : vector<1x256xf32> to vector<16x256xf32>
    %5 = arith.addf %2, %4 : vector<16x256xf32>
    %cst_5 = arith.constant 0.000000e+00 : f32
    %6 = vector.broadcast %cst_5 : f32 to vector<16x256xf32>
    %7 = arith.maximumf %5, %6 : vector<16x256xf32>
    %8 = arith.truncf %7 : vector<16x256xf32> to vector<16x256xbf16>
    %c0_6 = arith.constant 0 : index
    %c0_7 = arith.constant 0 : index
    %9 = vector.load %arg5[%c0_6, %c0_7] : memref<256x256xbf16, #tpu.memory_space<vmem>>, vector<256x256xbf16>
    %cst_8 = arith.constant dense<0.000000e+00> : vector<16x256xf32>
    %10 = tpu.matmul %8, %9, %cst_8 {dimension_numbers = #tpu.dot_dimension_numbers<[1], [0], [0], [1], [0, 0, 1, 1], [], []>} : vector<16x256xbf16>, vector<256x256xbf16>, vector<16x256xf32> -> vector<16x256xf32>
    %c0_9 = arith.constant 0 : index
    %c0_10 = arith.constant 0 : index
    %11 = vector.load %arg6[%c0_9, %c0_10] : memref<1x256xf32, #tpu.memory_space<vmem>>, vector<1x256xf32>
    %12 = vector.broadcast %11 : vector<1x256xf32> to vector<16x256xf32>
    %13 = arith.addf %10, %12 : vector<16x256xf32>
    %cst_11 = arith.constant 0.000000e+00 : f32
    %14 = vector.broadcast %cst_11 : f32 to vector<16x256xf32>
    %15 = arith.maximumf %13, %14 : vector<16x256xf32>
    %c0_12 = arith.constant 0 : index
    %c0_13 = arith.constant 0 : index
    %16 = vector.load %arg2[%c0_12, %c0_13] : memref<16x256xf32, #tpu.memory_space<vmem>>, vector<16x256xf32>
    %17 = arith.mulf %15, %16 : vector<16x256xf32>
    %18 = arith.truncf %17 : vector<16x256xf32> to vector<16x256xbf16>
    %c0_14 = arith.constant 0 : index
    %c0_15 = arith.constant 0 : index
    %19 = vector.load %arg7[%c0_14, %c0_15] : memref<256x128xbf16, #tpu.memory_space<vmem>>, vector<256x128xbf16>
    %cst_16 = arith.constant dense<0.000000e+00> : vector<16x128xf32>
    %20 = tpu.matmul %18, %19, %cst_16 {dimension_numbers = #tpu.dot_dimension_numbers<[1], [0], [0], [1], [0, 0, 1, 1], [], []>} : vector<16x256xbf16>, vector<256x128xbf16>, vector<16x128xf32> -> vector<16x128xf32>
    %c0_17 = arith.constant 0 : index
    %c0_18 = arith.constant 0 : index
    %21 = vector.load %arg8[%c0_17, %c0_18] : memref<1x128xf32, #tpu.memory_space<vmem>>, vector<1x128xf32>
    %22 = vector.broadcast %21 : vector<1x128xf32> to vector<16x128xf32>
    %23 = arith.addf %20, %22 : vector<16x128xf32>
    %c0_19 = arith.constant 0 : index
    %c0_20 = arith.constant 0 : index
    %24 = vector.load %arg9[%c0_19, %c0_20] : memref<16x128xf32, #tpu.memory_space<vmem>>, vector<16x128xf32>
    tpu.vector_store %arg9[%c0_19, %c0_20], %23 {strides = array<i32>} : memref<16x128xf32, #tpu.memory_space<vmem>>, vector<16x128xf32>,
    return
  }
  func.func @transform_0(%arg0: i32) -> (i32, i32) {
    %c0_i32 = arith.constant 0 : i32
    %c0_i32_0 = arith.constant 0 : i32
    return %arg0, %c0_i32 : i32, i32
  }
  func.func @transform_1(%arg0: i32) -> (i32, i32) {
    %c0_i32 = arith.constant 0 : i32
    %c0_i32_0 = arith.constant 0 : i32
    return %arg0, %c0_i32 : i32, i32
  }
  func.func @transform_2(%arg0: i32) -> (i32, i32) {
    %c0_i32 = arith.constant 0 : i32
    %c0_i32_0 = arith.constant 0 : i32
    %c0_i32_1 = arith.constant 0 : i32
    return %c0_i32, %c0_i32_0 : i32, i32
  }
  func.func @transform_3(%arg0: i32) -> (i32, i32) {
    %c0_i32 = arith.constant 0 : i32
    %c0_i32_0 = arith.constant 0 : i32
    %c0_i32_1 = arith.constant 0 : i32
    return %c0_i32, %c0_i32_0 : i32, i32
  }
  func.func @transform_4(%arg0: i32) -> (i32, i32) {
    %c0_i32 = arith.constant 0 : i32
    %c0_i32_0 = arith.constant 0 : i32
    %c0_i32_1 = arith.constant 0 : i32
    return %c0_i32, %c0_i32_0 : i32, i32
  }
  func.func @transform_5(%arg0: i32) -> (i32, i32) {
    %c0_i32 = arith.constant 0 : i32
    %c0_i32_0 = arith.constant 0 : i32
    %c0_i32_1 = arith.constant 0 : i32
    return %c0_i32, %c0_i32_0 : i32, i32
  }
  func.func @transform_6(%arg0: i32) -> (i32, i32) {
    %c0_i32 = arith.constant 0 : i32
    %c0_i32_0 = arith.constant 0 : i32
    %c0_i32_1 = arith.constant 0 : i32
    return %c0_i32, %c0_i32_0 : i32, i32
  }
  func.func @transform_7(%arg0: i32) -> (i32, i32) {
    %c0_i32 = arith.constant 0 : i32
    %c0_i32_0 = arith.constant 0 : i32
    %c0_i32_1 = arith.constant 0 : i32
    return %c0_i32, %c0_i32_0 : i32, i32
  }
  func.func @transform_8(%arg0: i32) -> (i32, i32) {
    %c0_i32 = arith.constant 0 : i32
    %c0_i32_0 = arith.constant 0 : i32
    return %arg0, %c0_i32 : i32, i32
  }
}

</mosaic_0001>

<bundles_post_ra>
// kernel: tpu_custom_call.1
= control target key start
LH: loop header
LB: loop body
LE: loop exit
PB: predicated region body
PF: predicated region fallthrough
CT: control target
= control target key end

     0   :  { %13 = vsyncpa [#allocation3], 0  ;;  %s1134_s0 = inlined_call_operand.hbm [shape: bf16[16,128], index: 0, kind: input, shape index: {}]   ;;  %s1135_s1 = inlined_call_operand.hbm [shape: f32[16,256], index: 1, kind: input, shape index: {}]   ;;  %s1136_s2 = inlined_call_operand.hbm [shape: bf16[128,256], index: 2, kind: input, shape index: {}]   ;;  %s1137_s3 = inlined_call_operand.vmem [shape: f32[1,256], index: 3, kind: input, shape index: {}]   ;;  %s1138_s4 = inlined_call_operand.hbm [shape: bf16[256,256], index: 4, kind: input, shape index: {}]   ;;  %s1139_s5 = inlined_call_operand.vmem [shape: f32[1,256], index: 5, kind: input, shape index: {}]   ;;  %s1140_s6 = inlined_call_operand.hbm [shape: bf16[256,128], index: 6, kind: input, shape index: {}]   ;;  %s1141_s7 = inlined_call_operand.vmem [shape: f32[1,128], index: 7, kind: input, shape index: {}]   ;;  %s1142_s8 = inlined_call_operand.hbm [shape: f32[16,128], index: 8, kind: output, shape index: {}]  }
   0x1   :  { %14 = vsyncpa [#allocation6], 0 }
   0x2   :  { %15 = vsyncpa [#allocation9], 0 }
   0x3   :  { %16 = vsyncpa [#allocation4], 0  ;;  %s1040_s27 = smov [#allocation5]  }
   0x4   :  { %s34_s28 = sshll.u32 %s1040_s27, 4  ;;  %s35_s28 = int_to_ptr.vmem [resolvable:$true] %s34_s28 }
   0x5   :  { %s920_s29 = scalar_lea.vmem %s35_s28, 512  ;;  %p925_p1 = scmp.lt.s32.totalorder %s35_s28, %s35_s28 }
   0x6   :  { %p921_p0 = scmp.ne.s32.totalorder %s35_s28, %s920_s29  ;;  %p926_p2 = scmp.lt.s32.totalorder %s920_s29, %s920_s29 }
   0x8   :  { %p927_p3 = por %p926_p2, %p925_p1 }
   0xa   :  { %p928_p4 = pnand %p927_p3, %p921_p0 }
   0xc   :  { %931 = shalt.err (!%p928_p4)
}
   0xd   :  { %s1041_s30 = smov 256   ;;  %s1042_s9 = smov 16  }
   0xe   :  { %40 = dma.hbm_to_vmem [thread:$0]  %s1135_s1, 512, %s35_s28, [#allocation6], %s1041_s30, %s1041_s30, %s1042_s9  }
   0xf   :  { %s1043_s12 = smov [#allocation8]   ;;  %s1044_s14 = smov [#allocation2]  }
  0x10   :  { %s60_s13 = sshll.u32 %s1043_s12, 4  ;;  %s22_s15 = sshll.u32 %s1044_s14, 4  ;;  %s61_s13 = int_to_ptr.vmem [resolvable:$true] %s60_s13  ;;  %s23_s15 = int_to_ptr.vmem [resolvable:$true] %s22_s15 }
  0x11   :  { %s940_s16 = scalar_lea.vmem %s61_s13, 4096  ;;  %p945_p6 = scmp.lt.s32.totalorder %s61_s13, %s61_s13 }
  0x12   :  { %p941_p5 = scmp.ne.s32.totalorder %s61_s13, %s940_s16  ;;  %p946_p7 = scmp.lt.s32.totalorder %s940_s16, %s940_s16 }
  0x14   :  { %p947_p8 = por %p946_p7, %p945_p6 }
  0x16   :  { %p948_p9 = pnand %p947_p8, %p941_p5 }
  0x18   :  { %951 = shalt.err (!%p948_p9)
}
  0x19   :  { %s1045_s17 = smov 128   ;;  %s1046_s18 = smov 8  }
  0x1a   :  { %66 = dma.hbm_to_vmem [thread:$0]  %s1138_s4, 4096, %s61_s13, [#allocation9], %s1045_s17, %s1045_s17, %s1046_s18  }
  0x1b   :  { %s960_s1 = scalar_lea.vmem %s23_s15, 128  ;;  %p965_p11 = scmp.lt.s32.totalorder %s23_s15, %s23_s15 }
  0x1c   :  { %p961_p10 = scmp.ne.s32.totalorder %s23_s15, %s960_s1  ;;  %p966_p12 = scmp.lt.s32.totalorder %s960_s1, %s960_s1 }
  0x1e   :  { %p967_p13 = por %p966_p12, %p965_p11 }
  0x20   :  { %p968_p0 = pnand %p967_p13, %p961_p10 }
  0x22   :  { %971 = shalt.err (!%p968_p0)
}
  0x23   :  { %s1047_s21 = smov 64   ;;  %s1048_s22 = smov 4  }
  0x24   :  { %28 = dma.hbm_to_vmem [thread:$0]  %s1134_s0, 128, %s23_s15, [#allocation3], %s1047_s21, %s1047_s21, %s1048_s22  }
  0x25   :  { %s1049_s25 = smov [#allocation7]   ;;  %s1050_s27 = smov [#allocation10]  }
  0x26   :  { %s46_s26 = sshll.u32 %s1049_s25, 4  ;;  %s74_s28 = sshll.u32 %s1050_s27, 4  ;;  %s47_s26 = int_to_ptr.vmem [resolvable:$true] %s46_s26  ;;  %s75_s28 = int_to_ptr.vmem [resolvable:$true] %s74_s28 }
  0x27   :  { %s980_s4 = scalar_lea.vmem %s47_s26, 2048  ;;  %p985_p2 = scmp.lt.s32.totalorder %s47_s26, %s47_s26 }
  0x28   :  { %p981_p1 = scmp.ne.s32.totalorder %s47_s26, %s980_s4  ;;  %p986_p3 = scmp.lt.s32.totalorder %s980_s4, %s980_s4 }
  0x2a   :  { %p987_p4 = por %p986_p3, %p985_p2 }
  0x2c   :  { %p988_p5 = pnand %p987_p4, %p981_p1 }
  0x2e   :  { %991 = shalt.err (!%p988_p5)
}
  0x2f   :  { %52 = dma.hbm_to_vmem [thread:$0]  %s1136_s2, 2048, %s47_s26, [#allocation6], %s1045_s17, %s1045_s17, %s1046_s18  }
  0x30   :  { %s1000_s0 = scalar_lea.vmem %s75_s28, 2048  ;;  %p1005_p7 = scmp.lt.s32.totalorder %s75_s28, %s75_s28 }
  0x31   :  { %p1001_p6 = scmp.ne.s32.totalorder %s75_s28, %s1000_s0  ;;  %p1006_p8 = scmp.lt.s32.totalorder %s1000_s0, %s1000_s0 }
  0x33   :  { %p1007_p9 = por %p1006_p8, %p1005_p7 }
  0x35   :  { %p1008_p10 = pnand %p1007_p9, %p1001_p6 }
  0x37   :  { %1011 = shalt.err (!%p1008_p10)
}
  0x38   :  { %80 = dma.hbm_to_vmem [thread:$0]  %s1140_s6, 2048, %s75_s28, [#allocation9], %s1047_s21, %s1047_s21, %s1048_s22  }
  0x39   :  { %1032 = dma.done.wait [#allocation3], 128  }
  0x3a   :  { %1033 = vsyncadd [#allocation3], 4294967168 }
  0x3b   :  { %1034 = dma.done.wait [#allocation6], 2560  }
  0x3c   :  { %1035 = vsyncadd [#allocation6], 4294964736 }
  0x3d   :  { %1036 = dma.done.wait [#allocation9], 6144  }
  0x3e   :  { %1037 = vsyncadd [#allocation9], 4294961152  ;;  %v1051_v0 = vmov 0   ;;  %v823_v1 = vld [vmem:[#allocation7 + $0x74] ss:$8 sps:$4 sm:$0xff]   ;;  %v900_v54 = vld [vmem:[#allocation10 + $0x68] sm:$0xff]   ;;  %v119_v58 = vlaneseq }
  0x3f   :  { %247 = vmatprep.mubr.bf16.mxu0 %v1051_v0  ;;  %v825_v2 = vld [vmem:[#allocation7 + $0x70] ss:$8 sps:$4 sm:$0xff]   ;;  %215 = vmatprep.subr.bf16.mxu0 %v823_v1  ;;  %v826_v3 = vld [vmem:[#allocation7 + $0x64] ss:$8 sps:$4 sm:$0xff]   ;;  %v828_v4 = vld [vmem:[#allocation7 + $0x60] ss:$8 sps:$4 sm:$0xff]  }
  0x40   :  { %216 = vmatpush1.bf16.msra.mxu0 %v825_v2  ;;  %v829_v5 = vld [vmem:[#allocation7 + $0x54] ss:$8 sps:$4 sm:$0xff]   ;;  %v831_v6 = vld [vmem:[#allocation7 + $0x50] ss:$8 sps:$4 sm:$0xff]   ;;  %v832_v7 = vld [vmem:[#allocation7 + $0x44] ss:$8 sps:$4 sm:$0xff]  }
  0x41   :  { %217 = vmatprep.subr.bf16.mxu0 %v826_v3  ;;  %v834_v8 = vld [vmem:[#allocation7 + $0x40] ss:$8 sps:$4 sm:$0xff]   ;;  %v835_v9 = vld [vmem:[#allocation7 + $0x34] ss:$8 sps:$4 sm:$0xff]   ;;  %v850_v11 = vld [vmem:[#allocation8 + $0x70] ss:$8 sps:$4 sm:$0xff]  }
  0x42   :  { %v848_v10 = vld [vmem:[#allocation8 + $0x74] ss:$8 sps:$4 sm:$0xff]   ;;  %v851_v12 = vld [vmem:[#allocation8 + $0x64] ss:$8 sps:$4 sm:$0xff]   ;;  %v837_v13 = vld [vmem:[#allocation7 + $0x30] ss:$8 sps:$4 sm:$0xff]  }
  0x43   :  { %468 = vmatprep.subr.bf16.mxu1 %v848_v10  ;;  %v853_v14 = vld [vmem:[#allocation8 + $0x60] ss:$8 sps:$4 sm:$0xff]   ;;  %v838_v15 = vld [vmem:[#allocation7 + $0x24] ss:$8 sps:$4 sm:$0xff]   ;;  %v854_v16 = vld [vmem:[#allocation8 + $0x54] ss:$8 sps:$4 sm:$0xff]  }
  0x44   :  { %218 = vmatpush1.bf16.msra.mxu0 %v828_v4  ;;  %469 = vmatpush1.bf16.msra.mxu1 %v850_v11  ;;  %v840_v17 = vld [vmem:[#allocation7 + $0x20] ss:$8 sps:$4 sm:$0xff]   ;;  %v856_v18 = vld [vmem:[#allocation8 + $0x50] ss:$8 sps:$4 sm:$0xff]   ;;  %v841_v19 = vld [vmem:[#allocation7 + $0x14] ss:$8 sps:$4 sm:$0xff]  }
  0x45   :  { %219 = vmatprep.subr.bf16.mxu0 %v829_v5  ;;  %470 = vmatprep.subr.bf16.mxu1 %v851_v12  ;;  %v857_v20 = vld [vmem:[#allocation8 + $0x44] ss:$8 sps:$4 sm:$0xff]   ;;  %v843_v21 = vld [vmem:[#allocation7 + $0x10] ss:$8 sps:$4 sm:$0xff]   ;;  %v859_v22 = vld [vmem:[#allocation8 + $0x40] ss:$8 sps:$4 sm:$0xff]  }
  0x46   :  { %v844_v23 = vld [vmem:[#allocation7 + $0x4] ss:$8 sps:$4 sm:$0xff]   ;;  %v860_v24 = vld [vmem:[#allocation8 + $0x34] ss:$8 sps:$4 sm:$0xff]   ;;  %v846_v25 = vld [vmem:[#allocation7] ss:$8 sps:$4 sm:$0xff]  }
  0x47   :  { %v862_v26 = vld [vmem:[#allocation8 + $0x30] ss:$8 sps:$4 sm:$0xff]   ;;  %v863_v28 = vld [vmem:[#allocation8 + $0x24] ss:$8 sps:$4 sm:$0xff]   ;;  %v865_v29 = vld [vmem:[#allocation8 + $0x20] ss:$8 sps:$4 sm:$0xff]  }
  0x48   :  { %220 = vmatpush1.bf16.msra.mxu0 %v831_v6  ;;  %471 = vmatpush1.bf16.msra.mxu1 %v853_v14  ;;  %v847_v27 = vld [vmem:[#allocation2] sm:$0xff]   ;;  %v869_v32 = vld [vmem:[#allocation8 + $0x4] ss:$8 sps:$4 sm:$0xff]   ;;  %v871_v33 = vld [vmem:[#allocation8] ss:$8 sps:$4 sm:$0xff]   ;;  %v120_v59 = vshrl.u32 %v119_v58, 7 }
  0x49   :  { %221 = vmatprep.subr.bf16.mxu0 %v832_v7  ;;  %472 = vmatprep.subr.bf16.mxu1 %v854_v16  ;;  %v866_v30 = vld [vmem:[#allocation8 + $0x14] ss:$8 sps:$4 sm:$0xff]   ;;  %v868_v31 = vld [vmem:[#allocation8 + $0x10] ss:$8 sps:$4 sm:$0xff]   ;;  %v875_v36 = vld [vmem:[#allocation8 + $0xe4] ss:$8 sps:$4 sm:$0xff]  }
  0x4a   :  { %v872_v34 = vld [vmem:[#allocation8 + $0xf4] ss:$8 sps:$4 sm:$0xff]   ;;  %v874_v35 = vld [vmem:[#allocation8 + $0xf0] ss:$8 sps:$4 sm:$0xff]   ;;  %v877_v37 = vld [vmem:[#allocation8 + $0xe0] ss:$8 sps:$4 sm:$0xff]  }
  0x4b   :  { %v878_v38 = vld [vmem:[#allocation8 + $0xd4] ss:$8 sps:$4 sm:$0xff]   ;;  %v880_v39 = vld [vmem:[#allocation8 + $0xd0] ss:$8 sps:$4 sm:$0xff]   ;;  %v881_v40 = vld [vmem:[#allocation8 + $0xc4] ss:$8 sps:$4 sm:$0xff]  }
  0x4c   :  { %222 = vmatpush1.bf16.msra.mxu0 %v834_v8  ;;  %473 = vmatpush1.bf16.msra.mxu1 %v856_v18  ;;  %v883_v41 = vld [vmem:[#allocation8 + $0xc0] ss:$8 sps:$4 sm:$0xff]   ;;  %v884_v42 = vld [vmem:[#allocation8 + $0xb4] ss:$8 sps:$4 sm:$0xff]   ;;  %v886_v43 = vld [vmem:[#allocation8 + $0xb0] ss:$8 sps:$4 sm:$0xff]  }
  0x4d   :  { %223 = vmatprep.subr.bf16.mxu0 %v835_v9  ;;  %474 = vmatprep.subr.bf16.mxu1 %v857_v20  ;;  %v887_v44 = vld [vmem:[#allocation8 + $0xa4] ss:$8 sps:$4 sm:$0xff]   ;;  %v889_v45 = vld [vmem:[#allocation8 + $0xa0] ss:$8 sps:$4 sm:$0xff]   ;;  %v890_v46 = vld [vmem:[#allocation8 + $0x94] ss:$8 sps:$4 sm:$0xff]  }
  0x4e   :  { %v892_v47 = vld [vmem:[#allocation8 + $0x90] ss:$8 sps:$4 sm:$0xff]   ;;  %v893_v48 = vld [vmem:[#allocation8 + $0x84] ss:$8 sps:$4 sm:$0xff]   ;;  %v895_v49 = vld [vmem:[#allocation8 + $0x80] ss:$8 sps:$4 sm:$0xff]  }
  0x4f   :  { %v896_v50 = vld [vmem:[#allocation10 + $0x78] sm:$0xff]   ;;  %v898_v52 = vld [vmem:[#allocation10 + $0x70] sm:$0xff]   ;;  %v901_v55 = vld [vmem:[#allocation10 + $0x28] sm:$0xff]   ;;  %v125_v60 = vsub.s32 1, %v120_v59  ;;  %v121_v61 = vsub.s32 0, %v120_v59  ;;  %s1052_s13 = smov [#allocation11]  }
  0x50   :  { %224 = vmatpush1.bf16.msra.mxu0 %v837_v13  ;;  %475 = vmatpush1.bf16.msra.mxu1 %v859_v22  ;;  %v897_v51 = vld [vmem:[#allocation10 + $0x38] sm:$0xff]   ;;  %v899_v53 = vld [vmem:[#allocation10 + $0x30] sm:$0xff]   ;;  %v902_v56 = vld [vmem:[#allocation10 + $0x60] sm:$0xff]   ;;  %s708_s14 = sshll.u32 %s1052_s13, 4  ;;  %s709_s14 = int_to_ptr.vmem [resolvable:$true] %s708_s14 }
  0x51   :  { %225 = vmatprep.subr.bf16.mxu0 %v838_v15  ;;  %476 = vmatprep.subr.bf16.mxu1 %v860_v24  ;;  %v903_v57 = vld [vmem:[#allocation10 + $0x20] sm:$0xff]   ;;  %v117_v62 = vld [vmem:[%s1137_s3] sm:$0x3]  ;;  %v907_v18 = vld [vmem:[#allocation10 + $0x10] sm:$0xff]   ;;  %s1012_s15 = scalar_lea.vmem %s709_s14, 256  ;;  %p1017_p12 = scmp.lt.s32.totalorder %s709_s14, %s709_s14 }
  0x52   :  { %v126_v0 = vrot.slane %v117_v62, %v125_v60  ;;  %v122_v1 = vrot.slane %v117_v62, %v121_v61  ;;  %v904_v15 = vld [vmem:[#allocation10 + $0x58] sm:$0xff]   ;;  %v909_v20 = vld [vmem:[#allocation10 + $0x8] sm:$0xff]   ;;  %v911_v22 = vld [vmem:[#allocation10] sm:$0xff]   ;;  %p1013_p11 = scmp.ne.s32.totalorder %s709_s14, %s1012_s15  ;;  %p1018_p13 = scmp.lt.s32.totalorder %s1012_s15, %s1012_s15 }
  0x53   :  { %v905_v16 = vld [vmem:[#allocation10 + $0x18] sm:$0xff]  }
  0x54   :  { %226 = vmatpush1.bf16.msra.mxu0 %v840_v17  ;;  %477 = vmatpush1.bf16.msra.mxu1 %v862_v26  ;;  %v906_v17 = vld [vmem:[#allocation10 + $0x50] sm:$0xff]   ;;  %p1019_p0 = por %p1018_p13, %p1017_p12 }
  0x55   :  { %227 = vmatprep.subr.bf16.mxu0 %v841_v19  ;;  %478 = vmatprep.subr.bf16.mxu1 %v863_v28  ;;  %v908_v19 = vld [vmem:[#allocation10 + $0x48] sm:$0xff]  }
  0x56   :  { %p1020_p1 = pnand %p1019_p0, %p1013_p11 }
  0x58   :  { %228 = vmatpush1.bf16.msra.mxu0 %v843_v21  ;;  %479 = vmatpush1.bf16.msra.mxu1 %v865_v29  ;;  %v910_v21 = vld [vmem:[#allocation10 + $0x40] sm:$0xff]  }
  0x59   :  { %229 = vmatprep.subr.bf16.mxu0 %v844_v23  ;;  %480 = vmatprep.subr.bf16.mxu1 %v866_v30  ;;  %v296_v23 = vld [vmem:[%s1139_s5] sm:$0x3] }
  0x5a   :  { %v305_v24 = vrot.slane %v296_v23, %v125_v60 }
  0x5c   :  { %230 = vmatpush1.bf16.msra.mxu0 %v846_v25  ;;  %481 = vmatpush1.bf16.msra.mxu1 %v868_v31  ;;  %v301_v25 = vrot.slane %v296_v23, %v121_v61 }
  0x5d   :  { %482 = vmatprep.subr.bf16.mxu1 %v869_v32  ;;  %788 = vmatprep.subr.bf16.mxu0 %v896_v50 }
  0x5f   :  { %248 = vmatmul.mubr.bf16.vlgmr.msra.gmra.mxu0 %v847_v27 }
  0x60   :  { %483 = vmatpush1.bf16.msra.mxu1 %v871_v33  ;;  %789 = vmatpush3.bf16.msra.mxu0 %v897_v51 }
  0x61   :  { %484 = vmatprep.subr.bf16.mxu1 %v872_v34  ;;  %790 = vmatprep.subr.bf16.mxu0 %v898_v52 }
  0x64   :  { %485 = vmatpush2.bf16.msra.mxu1 %v874_v35  ;;  %791 = vmatpush3.bf16.msra.mxu0 %v899_v53  ;;  %v517_v35 = vld [vmem:[#allocation5 + $0x10] sm:$0xff] }
  0x65   :  { %486 = vmatprep.subr.bf16.mxu1 %v875_v36  ;;  %792 = vmatprep.subr.bf16.mxu0 %v900_v54 }
  0x68   :  { %487 = vmatpush2.bf16.msra.mxu1 %v877_v37  ;;  %793 = vmatpush3.bf16.msra.mxu0 %v901_v55 }
  0x69   :  { %488 = vmatprep.subr.bf16.mxu1 %v878_v38  ;;  %794 = vmatprep.subr.bf16.mxu0 %v902_v56  ;;  %v516_v38 = vld [vmem:[#allocation5 + $0x8] sm:$0xff] }
  0x6c   :  { %489 = vmatpush2.bf16.msra.mxu1 %v880_v39  ;;  %795 = vmatpush3.bf16.msra.mxu0 %v903_v57  ;;  %v518_v39 = vld [vmem:[#allocation5 + $0x18] sm:$0xff] }
  0x6d   :  { %490 = vmatprep.subr.bf16.mxu1 %v881_v40  ;;  %796 = vmatprep.subr.bf16.mxu0 %v904_v15  ;;  %v515_v40 = vld [vmem:[#allocation5] sm:$0xff] }
  0x70   :  { %491 = vmatpush2.bf16.msra.mxu1 %v883_v41  ;;  %797 = vmatpush3.bf16.msra.mxu0 %v905_v16 }
  0x71   :  { %492 = vmatprep.subr.bf16.mxu1 %v884_v42  ;;  %798 = vmatprep.subr.bf16.mxu0 %v906_v17 }
  0x74   :  { %493 = vmatpush2.bf16.msra.mxu1 %v886_v43  ;;  %799 = vmatpush3.bf16.msra.mxu0 %v907_v18 }
  0x75   :  { %494 = vmatprep.subr.bf16.mxu1 %v887_v44  ;;  %800 = vmatprep.subr.bf16.mxu0 %v908_v19 }
  0x78   :  { %495 = vmatpush2.bf16.msra.mxu1 %v889_v45  ;;  %801 = vmatpush3.bf16.msra.mxu0 %v909_v20 }
  0x79   :  { %496 = vmatprep.subr.bf16.mxu1 %v890_v46  ;;  %802 = vmatprep.subr.bf16.mxu0 %v910_v21 }
  0x7c   :  { %497 = vmatpush2.bf16.msra.mxu1 %v892_v47  ;;  %803 = vmatpush3.bf16.msra.mxu0 %v911_v22 }
  0x7d   :  { %498 = vmatprep.subr.bf16.mxu1 %v893_v48 }
  0x80   :  { %499 = vmatpush2.bf16.msra.mxu1 %v895_v49  ;;  %v771_v49 = vld [vmem:[%s1141_s7] ss:$0 sm:$0xff] }
 0x11f   :  { %v249_v63 = vpop.f32.mrf.mxu0 }
 0x120   :  { %v250_v6 = vadd.f32 %v249_v63, %v122_v1 }
 0x121   :  { %v251_v2 = vpop.f32.mrf.mxu0 }
 0x122   :  { %v252_v4 = vadd.f32 %v251_v2, %v126_v0  ;;  %v258_v12 = vmax.f32 %v250_v6, 0.0 }
 0x123   :  { %v253_v3 = vpop.f32.mrf.mxu0 }
 0x124   :  { %v254_v5 = vadd.f32 %v253_v3, %v122_v1  ;;  %v259_v10 = vmax.f32 %v252_v4, 0.0 }
 0x125   :  { %v255_v7 = vpop.f32.mrf.mxu0 }
 0x126   :  { %v256_v8 = vadd.f32 %v255_v7, %v126_v0  ;;  %v260_v9 = vmax.f32 %v254_v5, 0.0 }
 0x128   :  { %v261_v11 = vmax.f32 %v256_v8, 0.0  ;;  %v262_v14 = vpack.c.bf16 %v260_v9, %v258_v12 }
 0x12a   :  { %v263_v13 = vpack.c.bf16 %v261_v11, %v259_v10 }
 0x12c   :  { %500 = vmatprep.mubr.bf16.mxu1 %v263_v13 }
 0x12d   :  { %501 = vmatmul.mubr.bf16.vlgmr.msra.gmra.mxu1 %v262_v14 }
 0x1ed   :  { %v502_v26 = vpop.f32.mrf.mxu1 }
 0x1ee   :  { %v503_v29 = vadd.f32 %v502_v26, %v301_v25 }
 0x1ef   :  { %v504_v27 = vpop.f32.mrf.mxu1 }
 0x1f0   :  { %v505_v28 = vadd.f32 %v504_v27, %v305_v24  ;;  %v511_v37 = vmax.f32 %v503_v29, 0.0 }
 0x1f1   :  { %v506_v30 = vpop.f32.mrf.mxu1 }
 0x1f2   :  { %v507_v31 = vadd.f32 %v506_v30, %v301_v25  ;;  %v512_v33 = vmax.f32 %v505_v28, 0.0  ;;  %v519_v45 = vmul.f32 %v515_v40, %v511_v37 }
 0x1f3   :  { %v508_v32 = vpop.f32.mrf.mxu1 }
 0x1f4   :  { %v513_v34 = vmax.f32 %v507_v31, 0.0  ;;  %v509_v36 = vadd.f32 %v508_v32, %v305_v24  ;;  %v520_v43 = vmul.f32 %v516_v38, %v512_v33 }
 0x1f6   :  { %v514_v41 = vmax.f32 %v509_v36, 0.0  ;;  %v521_v42 = vmul.f32 %v517_v35, %v513_v34 }
 0x1f8   :  { %v522_v44 = vmul.f32 %v518_v39, %v514_v41  ;;  %v523_v47 = vpack.c.bf16 %v521_v42, %v519_v45 }
 0x1fa   :  { %v524_v46 = vpack.c.bf16 %v522_v44, %v520_v43 }
 0x1fc   :  { %692 = vmatprep.mubr.bf16.mxu0 %v524_v46 }
 0x1fd   :  { %693 = vmatmul.mubr.bf16.vlgmr.msra.gmra.mxu0 %v523_v47 }
 0x2bd   :  { %v804_v48 = vpop.f32.mrf.mxu0 }
 0x2bf   :  { %v805_v50 = vpop.f32.mrf.mxu0 }
 0x2c0   :  { %v806_v51 = vadd.f32 %v805_v50, %v804_v48 }
 0x2c1   :  { %v807_v52 = vpop.f32.mrf.mxu0 }
 0x2c2   :  { %v695_v53 = vadd.f32 %v806_v51, %v771_v49 }
 0x2c3   :  { %v808_v54 = vpop.f32.mrf.mxu0 }
 0x2c4   :  { %701 = vst [vmem:[#allocation11] sm:$0xff] %v695_v53  ;;  %v809_v55 = vadd.f32 %v808_v54, %v807_v52 }
 0x2c6   :  { %v698_v56 = vadd.f32 %v809_v55, %v771_v49 }
 0x2c8   :  { %702 = vst [vmem:[#allocation11 + $0x8] sm:$0xff] %v698_v56 }
 0x2c9   :  { %1023 = shalt.err (!%p1020_p1)
}
 0x2ca   :  { %714 = dma.vmem_to_hbm [thread:$0]  %s709_s14, 256, %s1142_s8, [#allocation4], %s1045_s17, %s1045_s17, %s1046_s18  }
 0x2cb   :  { %1038 = dma.done.wait [#allocation4], 256  }
 0x2cc   :  { %1039 = vsyncadd [#allocation4], 4294967040 }
 0x2cd   :  { %718 = vsyncpa [#allocation3], 1 }
 0x2ce   :  { %719 = vsyncpa [#allocation6], 1 }
 0x2cf   :  { %720 = vsyncpa [#allocation9], 1 }
 0x2d0   :  { %721 = vsyncpa [#allocation4], 1 }

</bundles_post_ra>
